<compile_context>
chip_gen: v7x
topology: tpu7x:2x2x1
jax: 0.10.0
libtpu: 0.0.40
codegen_flags: <defaults>
</compile_context>

<pallas_src>
import numpy as np
import jax
import jax.numpy as jnp
from jax.experimental import pallas as pl
from jax.experimental.pallas import tpu as pltpu

# ------------------------- fixed "args" ------------------------------------
OBS_DIM   = 32
HIDDEN    = 64          # args.hidden_dim
N_ACT     = 4
ATOMS     = 51          # args.atoms
MIN_V     = -10.0       # args.minV
MAX_V     = 10.0        # args.maxV
NOISE_STD = 0.5         # args.noise_std
BATCH     = 2

# ------------------------- layout constants --------------------------------
LANE  = 128             # vreg lane width; each atom block padded to this
B_PAD = 8               # f32 sublane count; batch rows padded to this
NEG   = -1e30           # pad-atom logit bias (finite -> no inf-inf NaNs)

# packed array A (128 lanes wide): merged layer-1 weight + biases + support
#   rows 0:32,  cols 64:128 : feature weight  (obs lanes 0:32 -> feat lanes 64:128)
#   rows 64:128, cols 0:64  : value.linear1   (feat lanes 64:128 -> h_v lanes 0:64)
#   rows 64:128, cols 64:128: advantage.linear1 (-> h_a lanes 64:128)
R_B1   = 128            # feature bias (lanes 64:128)
R_BH1  = 129            # fused head-1 bias [bv1 | ba1]
R_SUP  = 130            # support padded with zeros
A_ROWS = 136            # rounded up to a multiple of 8 sublanes

# packed array B (512 lanes wide): dueling-folded head-2 weight + bias
#   rows 0:64  : Wv2 replicated per 128-lane action block
#   rows 64:128: Wa2_a - mean_a(Wa2) per action block
R_B2   = 128            # combined bias row (pad lanes = NEG)
B_ROWS = 136
B_COLS = N_ACT * LANE   # 512 = 4 action blocks of 128 lanes


# ------------------------------ kernel -------------------------------------
def qnet_kernel(x_ref, a_ref, b_ref, out_ref):
    x = x_ref[...]                                      # (8, 128), obs in lanes 0:32

    w1      = a_ref[0:LANE, :]                          # (128, 128) merged layer-1 weight
    b1      = a_ref[R_B1:R_B1 + 1, :]                   # (1, 128) feature bias (lanes 64:128)
    bh1     = a_ref[R_BH1:R_BH1 + 1, :]                 # (1, 128) [bv1 | ba1]
    support = a_ref[R_SUP:R_SUP + 1, :]                 # (1, 128), pad lanes = 0
    w2      = b_ref[0:LANE, :]                          # (128, 512) dueling-folded head-2
    b2      = b_ref[R_B2:R_B2 + 1, :]                   # (1, 512), pad lanes = NEG

    # MLPFeature: Linear + ReLU.  Feature lands in lanes 64:128 (lanes 0:64 stay 0).
    feat = jnp.maximum(
        jnp.dot(x, w1, preferred_element_type=jnp.float32) + b1, 0.0)

    # Fused value/advantage first layers (same merged weight, disjoint rows):
    # lanes 0:64 = h_v, lanes 64:128 = h_a.
    h = jnp.maximum(
        jnp.dot(feat, w1, preferred_element_type=jnp.float32) + bh1, 0.0)

    # Dueling-folded second layer: q[:, 128a : 128a+51] already equals
    # value + advantage_a - advantage.mean(actions) per atom; pad atoms = NEG.
    q = jnp.dot(h, w2, preferred_element_type=jnp.float32) + b2       # (8, 512)

    # Distributional head: per-action softmax over atoms, expectation over
    # the support.  Pad lanes carry ~NEG logits -> exp underflows to 0 and
    # pad support is 0, so they contribute nothing.
    lane_id = jax.lax.broadcasted_iota(jnp.int32, (B_PAD, LANE), 1)
    out = jnp.zeros((B_PAD, LANE), jnp.float32)
    for a in range(N_ACT):
        qa = q[:, a * LANE:(a + 1) * LANE]                             # (8, 128)
        qa = qa - jnp.max(qa, axis=-1, keepdims=True)
        e = jnp.exp(qa)
        num = jnp.sum(e * support, axis=-1, keepdims=True)
        den = jnp.sum(e, axis=-1, keepdims=True)
        qv = num * pl.reciprocal(den, approx=True)                     # (8, 1)
        out = jnp.where(lane_id == a, qv, out)
    out_ref[...] = out                                  # single lane-dense store


@jax.jit
def qnet_forward(x, packed_a, packed_b):
    batch = x.shape[0]
    x_pad = jnp.zeros((B_PAD, LANE), jnp.float32).at[:batch, :OBS_DIM].set(x)
    vmem = pl.BlockSpec(memory_space=pltpu.MemorySpace.VMEM)
    out = pl.pallas_call(
        qnet_kernel,
        out_shape=jax.ShapeDtypeStruct((B_PAD, LANE), jnp.float32),
        in_specs=[vmem, vmem, vmem],
        out_specs=vmem,
    )(x_pad, packed_a, packed_b)
    return out[:batch, :N_ACT]


# --------------------- deterministic parameter setup -----------------------
def _scaled_noise(key, n):
    x = jax.random.normal(key, (n,), dtype=jnp.float32)
    return jnp.sign(x) * jnp.sqrt(jnp.abs(x))


def make_noisy_linear(key, n_in, n_out):
    """Returns effective (W^T, b) for training-mode NoisyLinear."""
    k1, k2, k3, k4 = jax.random.split(key, 4)
    w_mean = jax.random.uniform(k1, (n_out, n_in), jnp.float32, -1.0, 1.0) / np.sqrt(n_in)
    w_std = jnp.full((n_out, n_in), NOISE_STD / np.sqrt(n_in), jnp.float32)
    b_mean = jax.random.uniform(k2, (n_out,), jnp.float32, -1.0, 1.0) / np.sqrt(n_in)
    b_std = jnp.full((n_out,), NOISE_STD / np.sqrt(n_out), jnp.float32)
    eps_in = _scaled_noise(k3, n_in)
    eps_out = _scaled_noise(k4, n_out)
    w_eff = w_mean + w_std * jnp.outer(eps_out, eps_in)
    b_eff = b_mean + b_std * eps_out
    return jnp.asarray(w_eff.T), b_eff


def make_plain_linear(key, n_in, n_out):
    k1, k2 = jax.random.split(key)
    bound = 1.0 / np.sqrt(n_in)
    w = jax.random.uniform(k1, (n_out, n_in), jnp.float32, -bound, bound)
    b = jax.random.uniform(k2, (n_out,), jnp.float32, -bound, bound)
    return jnp.asarray(w.T), b


def pack_params(wf, bf, wv1, bv1, wv2, bv2, wa1, ba1, wa2, ba2, support):
    """Pack all parameters into 2 lane-aligned f32 arrays.

    A: merged layer-1 weight (feature + fused value/advantage linear1),
       layer-1 biases and the support row.
    B: head-2 weight/bias with the dueling mean-subtraction folded in.
    """
    A = jnp.zeros((A_ROWS, LANE), jnp.float32)
    A = A.at[0:OBS_DIM, HIDDEN:2 * HIDDEN].set(wf)                   # feature weight
    A = A.at[HIDDEN:2 * HIDDEN, 0:HIDDEN].set(wv1)                   # value.linear1
    A = A.at[HIDDEN:2 * HIDDEN, HIDDEN:2 * HIDDEN].set(wa1)          # advantage.linear1
    A = A.at[R_B1, HIDDEN:2 * HIDDEN].set(bf)
    A = A.at[R_BH1, 0:HIDDEN].set(bv1)
    A = A.at[R_BH1, HIDDEN:2 * HIDDEN].set(ba1)
    A = A.at[R_SUP, 0:ATOMS].set(support)

    wa2_blk = wa2.reshape(HIDDEN, N_ACT, ATOMS)                      # (64, 4, 51)
    wa2_mean = wa2_blk.mean(axis=1)                                  # (64, 51)
    ba2_blk = ba2.reshape(N_ACT, ATOMS)
    ba2_mean = ba2_blk.mean(axis=0)

    B = jnp.zeros((B_ROWS, B_COLS), jnp.float32)
    b2row = jnp.full((B_COLS,), NEG, jnp.float32)                    # pad-atom bias = NEG
    for a in range(N_ACT):
        c0 = a * LANE
        B = B.at[0:HIDDEN, c0:c0 + ATOMS].set(wv2)                   # value path (shared)
        B = B.at[HIDDEN:2 * HIDDEN, c0:c0 + ATOMS].set(wa2_blk[:, a, :] - wa2_mean)
        b2row = b2row.at[c0:c0 + ATOMS].set(bv2 + ba2_blk[a] - ba2_mean)
    B = B.at[R_B2].set(b2row)
    return A, B


# --------------------------- pure-JAX reference -----------------------------
def qnet_reference(x, raw):
    wf, bf, wv1, bv1, wv2, bv2, wa1, ba1, wa2, ba2, support = raw
    feat = jnp.maximum(x @ wf + bf, 0.0)
    val = jnp.maximum(feat @ wv1 + bv1, 0.0) @ wv2 + bv2
    adv = jnp.maximum(feat @ wa1 + ba1, 0.0) @ wa2 + ba2
    val = val.reshape(-1, 1, ATOMS)
    adv = adv.reshape(-1, N_ACT, ATOMS)
    q = val + adv - adv.mean(axis=1, keepdims=True)
    q = jax.nn.softmax(q, axis=2)
    return (q * support.reshape(1, 1, ATOMS)).sum(axis=2)


# ------------------------------- main ---------------------------------------
if __name__ == "__main__":
    root = jax.random.PRNGKey(0)
    kx, kf, kv1, kv2, ka1, ka2 = jax.random.split(root, 6)

    x = jax.random.normal(kx, (BATCH, OBS_DIM), dtype=jnp.float32)

    wf, bf = make_plain_linear(kf, OBS_DIM, HIDDEN)               # MLPFeature
    wv1, bv1 = make_noisy_linear(kv1, HIDDEN, HIDDEN)             # value.linear1
    wv2, bv2 = make_noisy_linear(kv2, HIDDEN, ATOMS)              # value.linear2
    wa1, ba1 = make_noisy_linear(ka1, HIDDEN, HIDDEN)             # advantage.linear1
    wa2, ba2 = make_noisy_linear(ka2, HIDDEN, N_ACT * ATOMS)      # advantage.linear2
    support = jnp.linspace(MIN_V, MAX_V, ATOMS, dtype=jnp.float32)

    raw = (wf, bf, wv1, bv1, wv2, bv2, wa1, ba1, wa2, ba2, support)
    packed_a, packed_b = pack_params(*raw)

    out = qnet_forward(x, packed_a, packed_b)
    out = jax.block_until_ready(out)

    ref = qnet_reference(x, raw)
    # tolerance loosened for pl.reciprocal(approx=True) in the softmax denom
    np.testing.assert_allclose(np.asarray(out), np.asarray(ref), rtol=1e-2, atol=1e-2)

    print("KERNEL_OK")
</pallas_src>

<mosaic_0001>
module attributes {stable_mosaic.version = 11 : i64} {
  func.func @qnet_kernel(%arg0: memref<8x128xf32, #tpu.memory_space<vmem>>, %arg1: memref<136x128xf32, #tpu.memory_space<vmem>>, %arg2: memref<136x512xf32, #tpu.memory_space<vmem>>, %arg3: memref<8x128xf32, #tpu.memory_space<vmem>>) attributes {dimension_semantics = [], scalar_prefetch = 0 : i64, scratch_operands = 0 : i64, tpu.core_type = #tpu.core_type<tc>} {
    %c0 = arith.constant 0 : index
    %c0_0 = arith.constant 0 : index
    %0 = vector.load %arg0[%c0, %c0_0] : memref<8x128xf32, #tpu.memory_space<vmem>>, vector<8x128xf32>
    %c0_1 = arith.constant 0 : index
    %c0_2 = arith.constant 0 : index
    %1 = vector.load %arg1[%c0_1, %c0_2] : memref<136x128xf32, #tpu.memory_space<vmem>>, vector<128x128xf32>
    %c128 = arith.constant 128 : index
    %c0_3 = arith.constant 0 : index
    %2 = vector.load %arg1[%c128, %c0_3] : memref<136x128xf32, #tpu.memory_space<vmem>>, vector<1x128xf32>
    %c129 = arith.constant 129 : index
    %c0_4 = arith.constant 0 : index
    %3 = vector.load %arg1[%c129, %c0_4] : memref<136x128xf32, #tpu.memory_space<vmem>>, vector<1x128xf32>
    %c130 = arith.constant 130 : index
    %c0_5 = arith.constant 0 : index
    %4 = vector.load %arg1[%c130, %c0_5] : memref<136x128xf32, #tpu.memory_space<vmem>>, vector<1x128xf32>
    %c0_6 = arith.constant 0 : index
    %c0_7 = arith.constant 0 : index
    %5 = vector.load %arg2[%c0_6, %c0_7] : memref<136x512xf32, #tpu.memory_space<vmem>>, vector<128x512xf32>
    %c128_8 = arith.constant 128 : index
    %c0_9 = arith.constant 0 : index
    %6 = vector.load %arg2[%c128_8, %c0_9] : memref<136x512xf32, #tpu.memory_space<vmem>>, vector<1x512xf32>
    %cst = arith.constant dense<0.000000e+00> : vector<8x128xf32>
    %7 = tpu.matmul %0, %1, %cst {dimension_numbers = #tpu.dot_dimension_numbers<[1], [0], [0], [1], [0, 0, 1, 1], [], []>} : vector<8x128xf32>, vector<128x128xf32>, vector<8x128xf32> -> vector<8x128xf32>
    %8 = vector.broadcast %2 : vector<1x128xf32> to vector<8x128xf32>
    %9 = arith.addf %7, %8 : vector<8x128xf32>
    %cst_10 = arith.constant 0.000000e+00 : f32
    %10 = vector.broadcast %cst_10 : f32 to vector<8x128xf32>
    %11 = arith.maximumf %9, %10 : vector<8x128xf32>
    %cst_11 = arith.constant dense<0.000000e+00> : vector<8x128xf32>
    %12 = tpu.matmul %11, %1, %cst_11 {dimension_numbers = #tpu.dot_dimension_numbers<[1], [0], [0], [1], [0, 0, 1, 1], [], []>} : vector<8x128xf32>, vector<128x128xf32>, vector<8x128xf32> -> vector<8x128xf32>
    %13 = vector.broadcast %3 : vector<1x128xf32> to vector<8x128xf32>
    %14 = arith.addf %12, %13 : vector<8x128xf32>
    %cst_12 = arith.constant 0.000000e+00 : f32
    %15 = vector.broadcast %cst_12 : f32 to vector<8x128xf32>
    %16 = arith.maximumf %14, %15 : vector<8x128xf32>
    %cst_13 = arith.constant dense<0.000000e+00> : vector<8x512xf32>
    %17 = tpu.matmul %16, %5, %cst_13 {dimension_numbers = #tpu.dot_dimension_numbers<[1], [0], [0], [1], [0, 0, 1, 1], [], []>} : vector<8x128xf32>, vector<128x512xf32>, vector<8x512xf32> -> vector<8x512xf32>
    %18 = vector.broadcast %6 : vector<1x512xf32> to vector<8x512xf32>
    %19 = arith.addf %17, %18 : vector<8x512xf32>
    %20 = tpu.iota {dimensions = array<i32: 1>} : vector<8x128xi32>
    %cst_14 = arith.constant 0.000000e+00 : f32
    %21 = vector.broadcast %cst_14 : f32 to vector<8x128xf32>
    %22 = vector.extract_strided_slice %19 {offsets = [0, 0], sizes = [8, 128], strides = [1, 1]} : vector<8x512xf32> to vector<8x128xf32>
    %cst_15 = arith.constant dense<0xFF800000> : vector<8xf32>
    %23 = vector.multi_reduction <maximumf>, %22, %cst_15 [1] : vector<8x128xf32> to vector<8xf32>
    %24 = vector.shape_cast %23 : vector<8xf32> to vector<8x1xf32>
    %25 = vector.broadcast %24 : vector<8x1xf32> to vector<8x128xf32>
    %26 = arith.subf %22, %25 : vector<8x128xf32>
    %27 = math.exp %26 : vector<8x128xf32>
    %28 = vector.broadcast %4 : vector<1x128xf32> to vector<8x128xf32>
    %29 = arith.mulf %27, %28 : vector<8x128xf32>
    %cst_16 = arith.constant dense<0.000000e+00> : vector<8xf32>
    %30 = vector.multi_reduction <add>, %29, %cst_16 [1] : vector<8x128xf32> to vector<8xf32>
    %31 = vector.shape_cast %30 : vector<8xf32> to vector<8x1xf32>
    %cst_17 = arith.constant dense<0.000000e+00> : vector<8xf32>
    %32 = vector.multi_reduction <add>, %27, %cst_17 [1] : vector<8x128xf32> to vector<8xf32>
    %33 = vector.shape_cast %32 : vector<8xf32> to vector<8x1xf32>
    %34 = tpu.reciprocal %33 {approx = true} : vector<8x1xf32> -> vector<8x1xf32>
    %35 = arith.mulf %31, %34 : vector<8x1xf32>
    %c0_i32 = arith.constant 0 : i32
    %36 = vector.broadcast %c0_i32 : i32 to vector<8x128xi32>
    %37 = arith.cmpi eq, %20, %36 : vector<8x128xi32>
    %38 = vector.shape_cast %35 : vector<8x1xf32> to vector<8x1xf32>
    %39 = vector.broadcast %38 : vector<8x1xf32> to vector<8x128xf32>
    %40 = arith.select %37, %39, %21 : vector<8x128xi1>, vector<8x128xf32>
    %41 = vector.extract_strided_slice %19 {offsets = [0, 128], sizes = [8, 128], strides = [1, 1]} : vector<8x512xf32> to vector<8x128xf32>
    %cst_18 = arith.constant dense<0xFF800000> : vector<8xf32>
    %42 = vector.multi_reduction <maximumf>, %41, %cst_18 [1] : vector<8x128xf32> to vector<8xf32>
    %43 = vector.shape_cast %42 : vector<8xf32> to vector<8x1xf32>
    %44 = vector.broadcast %43 : vector<8x1xf32> to vector<8x128xf32>
    %45 = arith.subf %41, %44 : vector<8x128xf32>
    %46 = math.exp %45 : vector<8x128xf32>
    %47 = vector.broadcast %4 : vector<1x128xf32> to vector<8x128xf32>
    %48 = arith.mulf %46, %47 : vector<8x128xf32>
    %cst_19 = arith.constant dense<0.000000e+00> : vector<8xf32>
    %49 = vector.multi_reduction <add>, %48, %cst_19 [1] : vector<8x128xf32> to vector<8xf32>
    %50 = vector.shape_cast %49 : vector<8xf32> to vector<8x1xf32>
    %cst_20 = arith.constant dense<0.000000e+00> : vector<8xf32>
    %51 = vector.multi_reduction <add>, %46, %cst_20 [1] : vector<8x128xf32> to vector<8xf32>
    %52 = vector.shape_cast %51 : vector<8xf32> to vector<8x1xf32>
    %53 = tpu.reciprocal %52 {approx = true} : vector<8x1xf32> -> vector<8x1xf32>
    %54 = arith.mulf %50, %53 : vector<8x1xf32>
    %c1_i32 = arith.constant 1 : i32
    %55 = vector.broadcast %c1_i32 : i32 to vector<8x128xi32>
    %56 = arith.cmpi eq, %20, %55 : vector<8x128xi32>
    %57 = vector.shape_cast %54 : vector<8x1xf32> to vector<8x1xf32>
    %58 = vector.broadcast %57 : vector<8x1xf32> to vector<8x128xf32>
    %59 = arith.select %56, %58, %40 : vector<8x128xi1>, vector<8x128xf32>
    %60 = vector.extract_strided_slice %19 {offsets = [0, 256], sizes = [8, 128], strides = [1, 1]} : vector<8x512xf32> to vector<8x128xf32>
    %cst_21 = arith.constant dense<0xFF800000> : vector<8xf32>
    %61 = vector.multi_reduction <maximumf>, %60, %cst_21 [1] : vector<8x128xf32> to vector<8xf32>
    %62 = vector.shape_cast %61 : vector<8xf32> to vector<8x1xf32>
    %63 = vector.broadcast %62 : vector<8x1xf32> to vector<8x128xf32>
    %64 = arith.subf %60, %63 : vector<8x128xf32>
    %65 = math.exp %64 : vector<8x128xf32>
    %66 = vector.broadcast %4 : vector<1x128xf32> to vector<8x128xf32>
    %67 = arith.mulf %65, %66 : vector<8x128xf32>
    %cst_22 = arith.constant dense<0.000000e+00> : vector<8xf32>
    %68 = vector.multi_reduction <add>, %67, %cst_22 [1] : vector<8x128xf32> to vector<8xf32>
    %69 = vector.shape_cast %68 : vector<8xf32> to vector<8x1xf32>
    %cst_23 = arith.constant dense<0.000000e+00> : vector<8xf32>
    %70 = vector.multi_reduction <add>, %65, %cst_23 [1] : vector<8x128xf32> to vector<8xf32>
    %71 = vector.shape_cast %70 : vector<8xf32> to vector<8x1xf32>
    %72 = tpu.reciprocal %71 {approx = true} : vector<8x1xf32> -> vector<8x1xf32>
    %73 = arith.mulf %69, %72 : vector<8x1xf32>
    %c2_i32 = arith.constant 2 : i32
    %74 = vector.broadcast %c2_i32 : i32 to vector<8x128xi32>
    %75 = arith.cmpi eq, %20, %74 : vector<8x128xi32>
    %76 = vector.shape_cast %73 : vector<8x1xf32> to vector<8x1xf32>
    %77 = vector.broadcast %76 : vector<8x1xf32> to vector<8x128xf32>
    %78 = arith.select %75, %77, %59 : vector<8x128xi1>, vector<8x128xf32>
    %79 = vector.extract_strided_slice %19 {offsets = [0, 384], sizes = [8, 128], strides = [1, 1]} : vector<8x512xf32> to vector<8x128xf32>
    %cst_24 = arith.constant dense<0xFF800000> : vector<8xf32>
    %80 = vector.multi_reduction <maximumf>, %79, %cst_24 [1] : vector<8x128xf32> to vector<8xf32>
    %81 = vector.shape_cast %80 : vector<8xf32> to vector<8x1xf32>
    %82 = vector.broadcast %81 : vector<8x1xf32> to vector<8x128xf32>
    %83 = arith.subf %79, %82 : vector<8x128xf32>
    %84 = math.exp %83 : vector<8x128xf32>
    %85 = vector.broadcast %4 : vector<1x128xf32> to vector<8x128xf32>
    %86 = arith.mulf %84, %85 : vector<8x128xf32>
    %cst_25 = arith.constant dense<0.000000e+00> : vector<8xf32>
    %87 = vector.multi_reduction <add>, %86, %cst_25 [1] : vector<8x128xf32> to vector<8xf32>
    %88 = vector.shape_cast %87 : vector<8xf32> to vector<8x1xf32>
    %cst_26 = arith.constant dense<0.000000e+00> : vector<8xf32>
    %89 = vector.multi_reduction <add>, %84, %cst_26 [1] : vector<8x128xf32> to vector<8xf32>
    %90 = vector.shape_cast %89 : vector<8xf32> to vector<8x1xf32>
    %91 = tpu.reciprocal %90 {approx = true} : vector<8x1xf32> -> vector<8x1xf32>
    %92 = arith.mulf %88, %91 : vector<8x1xf32>
    %c3_i32 = arith.constant 3 : i32
    %93 = vector.broadcast %c3_i32 : i32 to vector<8x128xi32>
    %94 = arith.cmpi eq, %20, %93 : vector<8x128xi32>
    %95 = vector.shape_cast %92 : vector<8x1xf32> to vector<8x1xf32>
    %96 = vector.broadcast %95 : vector<8x1xf32> to vector<8x128xf32>
    %97 = arith.select %94, %96, %78 : vector<8x128xi1>, vector<8x128xf32>
    %c0_27 = arith.constant 0 : index
    %c0_28 = arith.constant 0 : index
    %98 = vector.load %arg3[%c0_27, %c0_28] : memref<8x128xf32, #tpu.memory_space<vmem>>, vector<8x128xf32>
    tpu.vector_store %arg3[%c0_27, %c0_28], %97 {strides = array<i32>} : memref<8x128xf32, #tpu.memory_space<vmem>>, vector<8x128xf32>,
    return
  }
}

</mosaic_0001>

<bundles_post_ra>
// kernel: qnet_forward.1
= control target key start
LH: loop header
LB: loop body
LE: loop exit
PB: predicated region body
PF: predicated region fallthrough
CT: control target
= control target key end

     0   :  { %8 = vsyncpa [#allocation3], 0  ;;  %s867_s0 = inlined_call_operand.vmem [shape: f32[8,128], index: 0, kind: input, shape index: {}]   ;;  %s868_s1 = inlined_call_operand.hbm [shape: f32[136,128], index: 1, kind: input, shape index: {}]   ;;  %s869_s2 = inlined_call_operand.hbm [shape: f32[136,512], index: 2, kind: input, shape index: {}]   ;;  %s870_s3 = inlined_call_operand.vmem [shape: f32[8,128], index: 3, kind: output, shape index: {}]  }
   0x1   :  { %9 = vsyncpa [#allocation5], 0  ;;  %s802_s12 = smov [#allocation2]   ;;  %s754_s16 = scalar_lea.hbm %s868_s1, 2176 }
   0x2   :  { %s17_s13 = sshll.u32 %s802_s12, 4  ;;  %p755_p0 = scmp.ne.s32.totalorder %s868_s1, %s754_s16  ;;  %s18_s13 = int_to_ptr.vmem [resolvable:$true] %s17_s13 }
   0x3   :  { %p758_p1 = scmp.lt.u32.totalorder %s754_s16, %s868_s1 }
   0x5   :  { %p760_p2 = pnand %p758_p1, %p755_p0 }
   0x7   :  { %763 = shalt.err (!%p760_p2)
}
   0x8   :  { %s764_s21 = scalar_lea.vmem %s18_s13, 2176  ;;  %p769_p4 = scmp.lt.s32.totalorder %s18_s13, %s18_s13 }
   0x9   :  { %p765_p3 = scmp.ne.s32.totalorder %s18_s13, %s764_s21  ;;  %p770_p5 = scmp.lt.s32.totalorder %s764_s21, %s764_s21 }
   0xb   :  { %p771_p6 = por %p770_p5, %p769_p4 }
   0xd   :  { %p772_p7 = pnand %p771_p6, %p765_p3 }
   0xf   :  { %775 = shalt.err (!%p772_p7)
}
  0x10   :  { %s803_s22 = smov 128   ;;  %s804_s23 = smov 8  }
  0x11   :  { %23 = dma.hbm_to_vmem [thread:$0]  %s868_s1, 2176, %s18_s13, [#allocation3], %s803_s22, %s803_s22, %s804_s23  }
  0x12   :  { %s805_s26 = smov [#allocation4]   ;;  %s776_s30 = scalar_lea.hbm %s869_s2, 8704 }
  0x13   :  { %s29_s27 = sshll.u32 %s805_s26, 4  ;;  %p777_p8 = scmp.ne.s32.totalorder %s869_s2, %s776_s30  ;;  %s30_s27 = int_to_ptr.vmem [resolvable:$true] %s29_s27 }
  0x14   :  { %p780_p9 = scmp.lt.u32.totalorder %s776_s30, %s869_s2 }
  0x16   :  { %p782_p10 = pnand %p780_p9, %p777_p8 }
  0x18   :  { %785 = shalt.err (!%p782_p10)
}
  0x19   :  { %s786_s8 = scalar_lea.vmem %s30_s27, 8704  ;;  %p791_p12 = scmp.lt.s32.totalorder %s30_s27, %s30_s27 }
  0x1a   :  { %p787_p11 = scmp.ne.s32.totalorder %s30_s27, %s786_s8  ;;  %p792_p13 = scmp.lt.s32.totalorder %s786_s8, %s786_s8 }
  0x1c   :  { %p793_p0 = por %p792_p13, %p791_p12 }
  0x1e   :  { %p794_p1 = pnand %p793_p0, %p787_p11 }
  0x20   :  { %797 = shalt.err (!%p794_p1)
}
  0x21   :  { %s806_s1 = smov 512   ;;  %s807_s9 = smov 32  }
  0x22   :  { %35 = dma.hbm_to_vmem [thread:$0]  %s869_s2, 8704, %s30_s27, [#allocation5], %s806_s1, %s806_s1, %s807_s9  }
  0x23   :  { %798 = dma.done.wait [#allocation3], 2176  }
  0x24   :  { %799 = vsyncadd [#allocation3], 4294965120 }
  0x25   :  { %800 = dma.done.wait [#allocation5], 8704  }
  0x26   :  { %801 = vsyncadd [#allocation5], 4294958592  ;;  %v808_v0 = vmov 0.0|0.0   ;;  %vm809_vm0 = vmmov 0   ;;  %v810_v1 = vmov 0.0   ;;  %v43_v2 = vld [vmem:[#allocation2] sm:$0xff] }
  0x27   :  { %617 = vmatprep.subr.bf16.mxu0 %v808_v0  ;;  %579 = vmatprep.mubr.msk.f32.mxu0 %vm809_vm0, %v810_v1  ;;  %v44_v3 = vld [vmem:[#allocation2 + $0x8] sm:$0xff]  ;;  %v45_v4 = vld [vmem:[#allocation2 + $0x10] sm:$0xff]  ;;  %v46_v6 = vld [vmem:[#allocation2 + $0x18] sm:$0xff] }
  0x28   :  { %641 = vmatprep.subr.bf16.mxu1 %v808_v0  ;;  %614 = vmatprep.mubr.msk.f32.mxu1 %vm809_vm0, %v810_v1  ;;  %v618_v5 = vpack.c.bf16 %v44_v3, %v43_v2  ;;  %v621_v7 = vpack.c.bf16 %v46_v6, %v45_v4  ;;  %v47_v8 = vld [vmem:[#allocation2 + $0x20] sm:$0xff]  ;;  %v48_v9 = vld [vmem:[#allocation2 + $0x28] sm:$0xff]  ;;  %v49_v11 = vld [vmem:[#allocation2 + $0x30] sm:$0xff] }
  0x29   :  { %v624_v10 = vpack.c.bf16 %v48_v9, %v47_v8  ;;  %v50_v12 = vld [vmem:[#allocation2 + $0x38] sm:$0xff]  ;;  %v51_v14 = vld [vmem:[#allocation2 + $0x40] sm:$0xff]  ;;  %v52_v15 = vld [vmem:[#allocation2 + $0x48] sm:$0xff] }
  0x2a   :  { %619 = vmatpush3.bf16.msra.mxu0 %v618_v5  ;;  %643 = vmatpush3.bf16.msra.mxu1 %v618_v5  ;;  %v627_v13 = vpack.c.bf16 %v50_v12, %v49_v11  ;;  %v630_v16 = vpack.c.bf16 %v52_v15, %v51_v14  ;;  %v53_v17 = vld [vmem:[#allocation2 + $0x50] sm:$0xff]  ;;  %v54_v18 = vld [vmem:[#allocation2 + $0x58] sm:$0xff]  ;;  %v55_v20 = vld [vmem:[#allocation2 + $0x60] sm:$0xff] }
  0x2b   :  { %620 = vmatprep.subr.bf16.mxu0 %v808_v0  ;;  %644 = vmatprep.subr.bf16.mxu1 %v808_v0  ;;  %v633_v19 = vpack.c.bf16 %v54_v18, %v53_v17  ;;  %v56_v21 = vld [vmem:[#allocation2 + $0x68] sm:$0xff]  ;;  %v57_v23 = vld [vmem:[#allocation2 + $0x70] sm:$0xff]  ;;  %v58_v24 = vld [vmem:[#allocation2 + $0x78] sm:$0xff] }
  0x2c   :  { %v636_v22 = vpack.c.bf16 %v56_v21, %v55_v20  ;;  %v639_v25 = vpack.c.bf16 %v58_v24, %v57_v23  ;;  %v42_v26 = vld [vmem:[%s867_s0] sm:$0xff]  ;;  %v63_v27 = vld [vmem:[#allocation4 + $0x8] sm:$0xff]  ;;  %v62_v32 = vld [vmem:[#allocation4] sm:$0xff] }
  0x2d   :  { %v67_v28 = vld [vmem:[#allocation4 + $0x28] sm:$0xff]  ;;  %v65_v29 = vld [vmem:[#allocation4 + $0x18] sm:$0xff]  ;;  %v66_v33 = vld [vmem:[#allocation4 + $0x20] sm:$0xff] }
  0x2e   :  { %622 = vmatpush3.bf16.msra.mxu0 %v621_v7  ;;  %646 = vmatpush3.bf16.msra.mxu1 %v621_v7  ;;  %v665_v30 = vpack.c.bf16 %v67_v28, %v63_v27  ;;  %v69_v31 = vld [vmem:[#allocation4 + $0x38] sm:$0xff]  ;;  %v667_v35 = vpack.c.bf16 %v66_v33, %v62_v32  ;;  %v71_v36 = vld [vmem:[#allocation4 + $0x48] sm:$0xff]  ;;  %v70_v39 = vld [vmem:[#allocation4 + $0x40] sm:$0xff] }
  0x2f   :  { %623 = vmatprep.subr.bf16.mxu0 %v808_v0  ;;  %647 = vmatprep.subr.bf16.mxu1 %v808_v0  ;;  %v697_v34 = vpack.c.bf16 %v69_v31, %v65_v29  ;;  %v75_v37 = vld [vmem:[#allocation4 + $0x68] sm:$0xff]  ;;  %v74_v40 = vld [vmem:[#allocation4 + $0x60] sm:$0xff]  ;;  %v510_v9 = vld [vmem:[#allocation2 + $0x80] ss:$0 sm:$0xff] }
  0x30   :  { %v669_v38 = vpack.c.bf16 %v75_v37, %v71_v36  ;;  %v671_v41 = vpack.c.bf16 %v74_v40, %v70_v39  ;;  %v79_v42 = vld [vmem:[#allocation4 + $0x88] sm:$0xff]  ;;  %v78_v45 = vld [vmem:[#allocation4 + $0x80] sm:$0xff]  ;;  %v68_v11 = vld [vmem:[#allocation4 + $0x30] sm:$0xff] }
  0x31   :  { %v83_v43 = vld [vmem:[#allocation4 + $0xa8] sm:$0xff]  ;;  %v82_v46 = vld [vmem:[#allocation4 + $0xa0] sm:$0xff]  ;;  %v77_v14 = vld [vmem:[#allocation4 + $0x78] sm:$0xff] }
  0x32   :  { %625 = vmatpush3.bf16.msra.mxu0 %v624_v10  ;;  %649 = vmatpush3.bf16.msra.mxu1 %v624_v10  ;;  %v673_v44 = vpack.c.bf16 %v83_v43, %v79_v42  ;;  %v675_v47 = vpack.c.bf16 %v82_v46, %v78_v45  ;;  %v87_v48 = vld [vmem:[#allocation4 + $0xc8] sm:$0xff]  ;;  %v86_v51 = vld [vmem:[#allocation4 + $0xc0] sm:$0xff]  ;;  %v64_v10 = vld [vmem:[#allocation4 + $0x10] sm:$0xff] }
  0x33   :  { %626 = vmatprep.subr.bf16.mxu0 %v808_v0  ;;  %650 = vmatprep.subr.bf16.mxu1 %v808_v0  ;;  %v91_v49 = vld [vmem:[#allocation4 + $0xe8] sm:$0xff]  ;;  %v90_v52 = vld [vmem:[#allocation4 + $0xe0] sm:$0xff]  ;;  %v699_v17 = vpack.c.bf16 %v68_v11, %v64_v10  ;;  %v72_v20 = vld [vmem:[#allocation4 + $0x50] sm:$0xff] }
  0x34   :  { %v677_v50 = vpack.c.bf16 %v91_v49, %v87_v48  ;;  %v679_v53 = vpack.c.bf16 %v90_v52, %v86_v51  ;;  %v95_v54 = vld [vmem:[#allocation4 + $0x108] sm:$0xff]  ;;  %v94_v57 = vld [vmem:[#allocation4 + $0x100] sm:$0xff]  ;;  %v76_v21 = vld [vmem:[#allocation4 + $0x70] sm:$0xff] }
  0x35   :  { %v99_v55 = vld [vmem:[#allocation4 + $0x128] sm:$0xff]  ;;  %v98_v58 = vld [vmem:[#allocation4 + $0x120] sm:$0xff]  ;;  %v85_v23 = vld [vmem:[#allocation4 + $0xb8] sm:$0xff]  ;;  %v703_v24 = vpack.c.bf16 %v76_v21, %v72_v20 }
  0x36   :  { %628 = vmatpush3.bf16.msra.mxu0 %v627_v13  ;;  %652 = vmatpush3.bf16.msra.mxu1 %v627_v13  ;;  %v681_v56 = vpack.c.bf16 %v99_v55, %v95_v54  ;;  %v683_v59 = vpack.c.bf16 %v98_v58, %v94_v57  ;;  %v103_v60 = vld [vmem:[#allocation4 + $0x148] sm:$0xff]  ;;  %v102_v63 = vld [vmem:[#allocation4 + $0x140] sm:$0xff]  ;;  %v73_v13 = vld [vmem:[#allocation4 + $0x58] sm:$0xff] }
  0x37   :  { %629 = vmatprep.subr.bf16.mxu0 %v808_v0  ;;  %653 = vmatprep.subr.bf16.mxu1 %v808_v0  ;;  %v107_v61 = vld [vmem:[#allocation4 + $0x168] sm:$0xff]  ;;  %v110_v6 = vld [vmem:[#allocation4 + $0x180] sm:$0xff]  ;;  %v84_v27 = vld [vmem:[#allocation4 + $0xb0] sm:$0xff] }
  0x38   :  { %v685_v62 = vpack.c.bf16 %v107_v61, %v103_v60  ;;  %v111_v3 = vld [vmem:[#allocation4 + $0x188] sm:$0xff]  ;;  %v114_v7 = vld [vmem:[#allocation4 + $0x1a0] sm:$0xff]  ;;  %v89_v28 = vld [vmem:[#allocation4 + $0xd8] sm:$0xff] }
  0x39   :  { %v115_v4 = vld [vmem:[#allocation4 + $0x1a8] sm:$0xff]  ;;  %v691_v8 = vpack.c.bf16 %v114_v7, %v110_v6  ;;  %v93_v29 = vld [vmem:[#allocation4 + $0xf8] sm:$0xff]  ;;  %v88_v32 = vld [vmem:[#allocation4 + $0xd0] sm:$0xff]  ;;  %v279_v6 = vlaneseq }
  0x3a   :  { %631 = vmatpush3.bf16.msra.mxu0 %v630_v16  ;;  %655 = vmatpush3.bf16.msra.mxu1 %v630_v16  ;;  %v689_v5 = vpack.c.bf16 %v115_v4, %v111_v3  ;;  %v709_v31 = vpack.c.bf16 %v93_v29, %v89_v28  ;;  %v92_v33 = vld [vmem:[#allocation4 + $0xf0] sm:$0xff]  ;;  %v105_v39 = vld [vmem:[#allocation4 + $0x158] sm:$0xff]  ;;  %v119_v52 = vld [vmem:[#allocation4 + $0x1c8] sm:$0xff] }
  0x3b   :  { %632 = vmatprep.subr.bf16.mxu0 %v808_v0  ;;  %656 = vmatprep.subr.bf16.mxu1 %v808_v0  ;;  %v711_v36 = vpack.c.bf16 %v92_v33, %v88_v32  ;;  %v109_v40 = vld [vmem:[#allocation4 + $0x178] sm:$0xff]  ;;  %v104_v43 = vld [vmem:[#allocation4 + $0x150] sm:$0xff]  ;;  %v118_v57 = vld [vmem:[#allocation4 + $0x1c0] sm:$0xff]  ;;  %v280_v7 = vshrl.u32 %v279_v6, 7 }
  0x3c   :  { %v717_v42 = vpack.c.bf16 %v109_v40, %v105_v39  ;;  %v113_v45 = vld [vmem:[#allocation4 + $0x198] sm:$0xff]  ;;  %v112_v49 = vld [vmem:[#allocation4 + $0x190] sm:$0xff]  ;;  %v122_v58 = vld [vmem:[#allocation4 + $0x1e0] sm:$0xff] }
  0x3d   :  { %v117_v46 = vld [vmem:[#allocation4 + $0x1b8] sm:$0xff]  ;;  %v695_v60 = vpack.c.bf16 %v122_v58, %v118_v57  ;;  %v120_v61 = vld [vmem:[#allocation4 + $0x1d0] sm:$0xff] }
  0x3e   :  { %634 = vmatpush3.bf16.msra.mxu0 %v633_v19  ;;  %658 = vmatpush3.bf16.msra.mxu1 %v633_v19  ;;  %v701_v19 = vpack.c.bf16 %v77_v14, %v73_v13  ;;  %v721_v48 = vpack.c.bf16 %v117_v46, %v113_v45  ;;  %v121_v54 = vld [vmem:[#allocation4 + $0x1d8] sm:$0xff]  ;;  %v285_v13 = vsub.s32 1, %v280_v7  ;;  %v293_v14 = vsub.s32 3, %v280_v7 }
  0x3f   :  { %635 = vmatprep.subr.bf16.mxu0 %v808_v0  ;;  %659 = vmatprep.subr.bf16.mxu1 %v808_v0  ;;  %v127_v10 = vld [vmem:[#allocation4 + $0x200] ss:$8 sm:$0xf]  ;;  %v512_v39 = vld [vmem:[#allocation2 + $0x82] ss:$0 sm:$0xff] }
  0x40   :  { %v294_v21 = vrot.slane %v127_v10, %v293_v14 }
  0x42   :  { %637 = vmatpush3.bf16.msra.mxu0 %v636_v22  ;;  %661 = vmatpush3.bf16.msra.mxu1 %v636_v22  ;;  %v81_v22 = vld [vmem:[#allocation4 + $0x98] sm:$0xff] }
  0x43   :  { %638 = vmatprep.subr.bf16.mxu0 %v808_v0  ;;  %662 = vmatprep.subr.bf16.mxu1 %v808_v0  ;;  %v106_v0 = vld [vmem:[#allocation4 + $0x160] sm:$0xff] }
  0x44   :  { %v687_v2 = vpack.c.bf16 %v106_v0, %v102_v63  ;;  %v511_v0 = vld [vmem:[#allocation2 + $0x81] ss:$0 sm:$0xff] }
  0x46   :  { %640 = vmatpush3.bf16.msra.mxu0 %v639_v25  ;;  %664 = vmatpush3.bf16.msra.mxu1 %v639_v25  ;;  %v705_v25 = vpack.c.bf16 %v85_v23, %v81_v22 }
  0x47   :  { %666 = vmatprep.subr.bf16.mxu0 %v665_v30  ;;  %698 = vmatprep.subr.bf16.mxu1 %v697_v34  ;;  %v97_v34 = vld [vmem:[#allocation4 + $0x118] sm:$0xff] }
  0x49   :  { %580 = vmatmul.mubr.f32.vlgmr.msra.gmra.mrb[0].mxu0 %v42_v26  ;;  %v80_v26 = vld [vmem:[#allocation4 + $0x90] sm:$0xff] }
  0x4a   :  { %363 = vmatprep.mubr.f32.mxu0 %v810_v1  ;;  %668 = vmatpush1.bf16.msra.mxu0 %v667_v35  ;;  %v707_v30 = vpack.c.bf16 %v84_v27, %v80_v26  ;;  %v101_v35 = vld [vmem:[#allocation4 + $0x138] sm:$0xff] }
  0x4b   :  { %670 = vmatprep.subr.bf16.mxu0 %v669_v38  ;;  %v713_v37 = vpack.c.bf16 %v101_v35, %v97_v34  ;;  %v96_v38 = vld [vmem:[#allocation4 + $0x110] sm:$0xff] }
  0x4e   :  { %672 = vmatpush1.bf16.msra.mxu0 %v671_v41 }
  0x4f   :  { %674 = vmatprep.subr.bf16.mxu0 %v673_v44  ;;  %v108_v44 = vld [vmem:[#allocation4 + $0x170] sm:$0xff] }
  0x52   :  { %676 = vmatpush1.bf16.msra.mxu0 %v675_v47  ;;  %v719_v47 = vpack.c.bf16 %v108_v44, %v104_v43 }
  0x53   :  { %678 = vmatprep.subr.bf16.mxu0 %v677_v50  ;;  %v116_v50 = vld [vmem:[#allocation4 + $0x1b0] sm:$0xff] }
  0x54   :  { %v723_v51 = vpack.c.bf16 %v116_v50, %v112_v49  ;;  %v442_v49 = vand.u32 127, %v279_v6 }
  0x56   :  { %680 = vmatpush1.bf16.msra.mxu0 %v679_v53  ;;  %v123_v53 = vld [vmem:[#allocation4 + $0x1e8] sm:$0xff]  ;;  %vm459_vm1 = vcmp.eq.s32.totalorder %v442_v49, 0  ;;  %vm473_vm2 = vcmp.eq.s32.totalorder %v442_v49, 1  ;;  %vm487_vm3 = vcmp.eq.s32.totalorder %v442_v49, 2  ;;  %vm501_vm4 = vcmp.eq.s32.totalorder %v442_v49, 3 }
  0x57   :  { %682 = vmatprep.subr.bf16.mxu0 %v681_v56  ;;  %v693_v55 = vpack.c.bf16 %v123_v53, %v119_v52  ;;  %v125_v56 = vld [vmem:[#allocation4 + $0x1f8] sm:$0xff] }
  0x5a   :  { %684 = vmatpush1.bf16.msra.mxu0 %v683_v59  ;;  %v725_v59 = vpack.c.bf16 %v125_v56, %v121_v54 }
  0x5b   :  { %686 = vmatprep.subr.bf16.mxu0 %v685_v62  ;;  %v124_v62 = vld [vmem:[#allocation4 + $0x1f0] sm:$0xff] }
  0x5c   :  { %v727_v63 = vpack.c.bf16 %v124_v62, %v120_v61 }
  0x5e   :  { %688 = vmatpush1.bf16.msra.mxu0 %v687_v2 }
  0x5f   :  { %690 = vmatprep.subr.bf16.mxu0 %v689_v5 }
  0x62   :  { %692 = vmatpush1.bf16.msra.mxu0 %v691_v8  ;;  %v281_v8 = vsub.s32 0, %v280_v7 }
  0x63   :  { %694 = vmatprep.subr.bf16.mxu0 %v693_v55 }
  0x64   :  { %v282_v11 = vrot.slane %v127_v10, %v281_v8 }
  0x66   :  { %696 = vmatpush1.bf16.msra.mxu0 %v695_v60 }
 0x11c   :  { %v198_v12 = vpop.f32.mrb[0].mxu0 }
 0x11d   :  { %v199_v15 = vadd.f32 %v510_v9, %v198_v12  ;;  %v581_v16 = vpop.f32.mrb[1].mxu0  ;;  %v289_v9 = vsub.s32 2, %v280_v7 }
 0x11f   :  { %v202_v18 = vmax.f32 %v199_v15, 0.0  ;;  %v290_v12 = vrot.slane %v127_v10, %v289_v9 }
 0x121   :  { %615 = vmatmul.mubr.f32.vlgmr.msra.gmra.mrb[0].mxu1 %v202_v18 }
 0x122   :  { %700 = vmatpush1.bf16.msra.mxu1 %v699_v17  ;;  %434 = vmatprep.mubr.f32.mxu1 %v810_v1  ;;  %v100_v1 = vld [vmem:[#allocation4 + $0x130] sm:$0xff] }
 0x123   :  { %702 = vmatprep.subr.bf16.mxu1 %v701_v19  ;;  %v715_v41 = vpack.c.bf16 %v100_v1, %v96_v38  ;;  %v286_v19 = vrot.slane %v127_v10, %v285_v13 }
 0x126   :  { %704 = vmatpush1.bf16.msra.mxu1 %v703_v24 }
 0x127   :  { %706 = vmatprep.subr.bf16.mxu1 %v705_v25 }
 0x12a   :  { %708 = vmatpush1.bf16.msra.mxu1 %v707_v30 }
 0x12b   :  { %710 = vmatprep.subr.bf16.mxu1 %v709_v31 }
 0x12e   :  { %712 = vmatpush1.bf16.msra.mxu1 %v711_v36 }
 0x12f   :  { %714 = vmatprep.subr.bf16.mxu1 %v713_v37 }
 0x132   :  { %716 = vmatpush1.bf16.msra.mxu1 %v715_v41 }
 0x133   :  { %718 = vmatprep.subr.bf16.mxu1 %v717_v42 }
 0x136   :  { %720 = vmatpush1.bf16.msra.mxu1 %v719_v47 }
 0x137   :  { %722 = vmatprep.subr.bf16.mxu1 %v721_v48 }
 0x13a   :  { %724 = vmatpush1.bf16.msra.mxu1 %v723_v51 }
 0x13b   :  { %726 = vmatprep.subr.bf16.mxu1 %v725_v59 }
 0x13e   :  { %728 = vmatpush1.bf16.msra.mxu1 %v727_v63 }
 0x1f4   :  { %v273_v2 = vpop.f32.mrb[0].mxu1 }
 0x1f5   :  { %v274_v3 = vadd.f32 %v511_v0, %v273_v2  ;;  %v616_v4 = vpop.f32.mrb[1].mxu1 }
 0x1f7   :  { %v277_v5 = vmax.f32 %v274_v3, 0.0 }
 0x1f9   :  { %364 = vmatmul.mubr.f32.vlgmr.msra.gmra.mrb[2].mxu0 %v277_v5  ;;  %435 = vmatmul.mubr.f32.vlgmr.msra.gmra.mrb[2].mxu1 %v277_v5 }
 0x2cc   :  { %v365_v15 = vpop.f32.mrb[2].mxu0  ;;  %v436_v16 = vpop.f32.mrb[2].mxu1 }
 0x2cd   :  { %v366_v17 = vadd.f32 %v365_v15, %v282_v11  ;;  %v437_v18 = vadd.f32 %v436_v16, %v290_v12  ;;  %v367_v20 = vpop.f32.mrb[3].mxu0  ;;  %v438_v22 = vpop.f32.mrb[3].mxu1 }
 0x2ce   :  { %v368_v23 = vadd.f32 %v367_v20, %v286_v19  ;;  %v439_v24 = vadd.f32 %v438_v22, %v294_v21 }
 0x2cf   :  { %475 = vmax.xlane.f32.xlu1 %v437_v18  ;;  %443 = vmax.xlane.f32.xlu0 %v366_v17 }
 0x2d3   :  { %489 = vmax.xlane.f32.xlu1 %v439_v24  ;;  %461 = vmax.xlane.f32.xlu0 %v368_v23 }
 0x35c   :  { %v476_v25 = vpop.xlane.xlu1 %475  ;;  %v444_v26 = vpop.xlane.xlu0 %443 }
 0x35d   :  { %v477_v27 = vsub.f32 %v437_v18, %v476_v25  ;;  %v445_v28 = vsub.f32 %v366_v17, %v444_v26 }
 0x35f   :  { %v446_v29 = vmul.f32 1.442695, %v445_v28  ;;  %v478_v32 = vmul.f32 1.442695, %v477_v27 }
 0x360   :  { %v490_v30 = vpop.xlane.xlu1 %489  ;;  %v462_v31 = vpop.xlane.xlu0 %461 }
 0x361   :  { %v463_v33 = vsub.f32 %v368_v23, %v462_v31  ;;  %738 = vpow2.f32 %v446_v29  ;;  %v491_v34 = vsub.f32 %v439_v24, %v490_v30 }
 0x362   :  { %740 = vpow2.f32 %v478_v32 }
 0x363   :  { %v464_v35 = vmul.f32 1.442695, %v463_v33  ;;  %v492_v36 = vmul.f32 1.442695, %v491_v34 }
 0x365   :  { %742 = vpow2.f32 %v464_v35 }
 0x366   :  { %744 = vpow2.f32 %v492_v36 }
 0x36b   :  { %v739_v37 = vpop.eup %738 }
 0x36c   :  { %455 = vadd.xlane.f32.xlu0 %v739_v37  ;;  %v741_v38 = vpop.eup %740  ;;  %v452_v40 = vmul.f32 %v739_v37, %v512_v39 }
 0x36d   :  { %v480_v42 = vmul.f32 %v741_v38, %v512_v39 }
 0x36f   :  { %v743_v1 = vpop.eup %742 }
 0x370   :  { %483 = vadd.xlane.f32.xlu0 %v741_v38  ;;  %469 = vadd.xlane.f32.xlu1 %v743_v1  ;;  %v745_v41 = vpop.eup %744  ;;  %v466_v43 = vmul.f32 %v743_v1, %v512_v39 }
 0x371   :  { %v494_v44 = vmul.f32 %v745_v41, %v512_v39 }
 0x374   :  { %453 = vadd.xlane.f32.xlu0 %v452_v40  ;;  %497 = vadd.xlane.f32.xlu1 %v745_v41 }
 0x378   :  { %481 = vadd.xlane.f32.xlu0 %v480_v42  ;;  %467 = vadd.xlane.f32.xlu1 %v466_v43 }
 0x37c   :  { %495 = vadd.xlane.f32.xlu1 %v494_v44 }
 0x3f9   :  { %v456_v45 = vpop.xlane.xlu0 %455 }
 0x3fa   :  { %746 = vrcp.f32 %v456_v45 }
 0x3fd   :  { %v470_v46 = vpop.xlane.xlu1 %469  ;;  %v484_v47 = vpop.xlane.xlu0 %483 }
 0x3fe   :  { %748 = vrcp.f32 %v470_v46 }
 0x3ff   :  { %750 = vrcp.f32 %v484_v47 }
 0x401   :  { %v498_v48 = vpop.xlane.xlu1 %497  ;;  %v454_v50 = vpop.xlane.xlu0 %453 }
 0x402   :  { %752 = vrcp.f32 %v498_v48 }
 0x404   :  { %v747_v51 = vpop.eup %746 }
 0x405   :  { %v458_v52 = vmul.f32 %v747_v51, %v454_v50  ;;  %v468_v53 = vpop.xlane.xlu1 %467  ;;  %v482_v57 = vpop.xlane.xlu0 %481 }
 0x407   :  { %v460_v58 = vsel %vm459_vm1, %v458_v52, 0.0 }
 0x408   :  { %v749_v54 = vpop.eup %748 }
 0x409   :  { %v751_v55 = vpop.eup %750  ;;  %v472_v56 = vmul.f32 %v749_v54, %v468_v53  ;;  %v496_v62 = vpop.xlane.xlu1 %495 }
 0x40a   :  { %v486_v59 = vmul.f32 %v751_v55, %v482_v57 }
 0x40b   :  { %v474_v60 = vsel %vm473_vm2, %v472_v56, %v460_v58 }
 0x40c   :  { %v753_v61 = vpop.eup %752  ;;  %v488_v0 = vsel %vm487_vm3, %v486_v59, %v474_v60 }
 0x40d   :  { %v500_v63 = vmul.f32 %v753_v61, %v496_v62 }
 0x40f   :  { %v502_v2 = vsel %vm501_vm4, %v500_v63, %v488_v0 }
 0x410   :  { %503 = vst [vmem:[%s870_s3] sm:$0xff] %v502_v2 }
 0x411   :  { %508 = vsyncpa [#allocation3], 1 }
 0x412   :  { %509 = vsyncpa [#allocation5], 1 }

</bundles_post_ra>
